<compile_context>
chip_gen: v6e
topology: v6e:2x2x1
jax: 0.10.0
libtpu: 0.0.40
codegen_flags: <defaults>
</compile_context>

<pallas_src>
import functools

import jax
import jax.numpy as jnp
from jax.experimental import pallas as pl
from jax.experimental.pallas import tpu as pltpu


# ----------------------------- parameter prep --------------------------------

def _quantize_weight_dorefa(w, bitW):
    """DoReFa weight quantization (matches quantize_fn used by self_conv)."""
    if bitW >= 32:
        return w
    if bitW == 1:
        e = jnp.mean(jnp.abs(w))
        return jnp.sign(w) * e
    t = jnp.tanh(w)
    wn = t / (2.0 * jnp.max(jnp.abs(t))) + 0.5          # in [0, 1]
    n = float(2 ** bitW - 1)
    wq = jnp.round(wn * n) / n
    return 2.0 * wq - 1.0                               # in [-1, 1]


def _vmem_capacity_bytes():
    try:
        return int(pltpu.get_tpu_info().vmem_capacity_bytes)
    except Exception:
        return 64 * 1024 * 1024     # conservative: v7x per-TensorCore VMEM


def _cdiv(a, b):
    return -(-a // b)


def _round_up(x, m):
    return ((x + m - 1) // m) * m


def _pick_tile(HW, C, P, in_bytes, out_bytes, n_images):
    """Padding-aware lane-tile selection.

    Returns (tm, n_tiles).  tm is either the full extent HW (single block, no
    masking) or a multiple of 128 (ragged last block handled by Pallas store
    masking).  The tile is the largest that fits the per-core VMEM budget
    double-buffered, then shrunk to minimize padding waste.
    """
    cap = _vmem_capacity_bytes()
    usable = int(0.5 * cap)                              # headroom for compiler scratch
    fixed = C * P * 2 + P * 4                            # single-buffered weights + bias
    per_col = 2 * C * in_bytes + 2 * P * out_bytes       # double-buffered x + out per lane
    max_tm = max(128, (usable - fixed) // per_col)
    max_tm = min(max_tm, 8192)                           # >=512 lanes already ~85% of roofline
    max_tm = max(128, (max_tm // 128) * 128)

    # v7x has 2 TensorCores: guarantee >= 2 parallel grid steps when N == 1.
    min_tiles = 2 if (n_images == 1 and HW >= 256) else 1

    n_tiles = max(min_tiles, _cdiv(HW, max_tm))
    if n_tiles == 1:
        return HW, 1                                     # full-extent block: zero padding
    tm = _round_up(_cdiv(HW, n_tiles), 128)
    while tm > max_tm:                                   # rounding pushed over budget
        n_tiles += 1
        tm = _round_up(_cdiv(HW, n_tiles), 128)
    return tm, n_tiles


def _const_spec(shape):
    """BlockSpec for an operand that is identical at every grid step."""
    ndim = len(shape)
    idx = lambda n, j: (0,) * ndim
    try:
        # Constant across the grid -> single-buffer to save VMEM.
        return pl.BlockSpec(shape, idx, pipeline_mode=pl.Buffered(1))
    except (TypeError, AttributeError):                  # older jax: no pipeline_mode
        return pl.BlockSpec(shape, idx)


# --------------------------------- kernel ------------------------------------

def _downsample_kernel(x_ref, w_ref, b_ref, o_ref):
    # x_ref: (1, C, tm)  f32 or bf16   spatial (possibly batch-packed) on lanes
    # w_ref: (P, C)      bf16          DoReFa-quantized weights, BN scale folded in
    # b_ref: (P, 1)      f32           folded BN bias
    # o_ref: (1, P, tm)  out dtype (default bf16)
    x = x_ref[0].astype(jnp.bfloat16)          # in-kernel VPU cast is free under DMA/MXU
    acc = jnp.dot(w_ref[...], x, preferred_element_type=jnp.float32)
    o_ref[0] = (acc + b_ref[...]).astype(o_ref.dtype)


# -------------------------------- wrapper -------------------------------------

@functools.partial(jax.jit,
                   static_argnames=("stride", "bitW", "eps", "out_dtype"))
def downsample_layer_forward(x, weight, gamma, beta, running_mean, running_var,
                             *, stride=1, bitW=8, eps=1e-5,
                             out_dtype=jnp.bfloat16):
    """x: [N, C, H, W] float32 (NCHW).  weight: [P, C, 1, 1].  Returns NCHW out_dtype."""
    N, C, H, W = x.shape
    P = weight.shape[0]
    Ho = (H + stride - 1) // stride
    Wo = (W + stride - 1) // stride
    HWo = Ho * Wo

    # --- parameter prep (tiny, not the hot path) ------------------------------
    w_q = _quantize_weight_dorefa(weight.astype(jnp.float32), bitW).reshape(P, C)
    inv_std = 1.0 / jnp.sqrt(running_var.astype(jnp.float32) + eps)
    scale = gamma.astype(jnp.float32) * inv_std                     # [P]
    bias = beta.astype(jnp.float32) - running_mean.astype(jnp.float32) * scale
    w_mat = (w_q * scale[:, None]).astype(jnp.bfloat16)             # BN scale folded in
    b_col = bias.reshape(P, 1).astype(jnp.float32)

    # --- activation layout -----------------------------------------------------
    if stride == 1:
        # Fully fused: metadata-only reshape, bf16 cast happens inside the kernel.
        xs = x.reshape(N, C, HWo)
    else:
        # One fused XLA op (strided slice + bf16 cast) feeding the kernel.
        # TODO(synk): fuse this subsample into the kernel DMA (pl.Element row
        # offsets / strided pl.ds) to remove the extra HBM pass entirely.
        xs = x[:, :, ::stride, ::stride].astype(jnp.bfloat16).reshape(N, C, HWo)

    pack_batch = (HWo < 256) and (N > 1)
    if pack_batch:
        # Small spatial extent (late ResNet stages): fold the batch into the lane
        # axis so stores stay lane-dense (>= 128 lanes).  Cheap: tensors are tiny.
        xs = jnp.transpose(xs, (1, 0, 2)).reshape(1, C, N * HWo)
        if xs.dtype != jnp.bfloat16:
            xs = xs.astype(jnp.bfloat16)                 # fold cast into this copy
        N_k, HW_k = 1, N * HWo
    else:
        N_k, HW_k = N, HWo

    in_bytes = jnp.dtype(xs.dtype).itemsize
    out_bytes = jnp.dtype(out_dtype).itemsize
    tm, n_tiles = _pick_tile(HW_k, C, P, in_bytes, out_bytes, N_k)

    cap = _vmem_capacity_bytes()
    footprint = (2 * C * tm * in_bytes + 2 * P * tm * out_bytes
                 + C * P * 2 + P * 4)
    vmem_limit = int(min(0.9 * cap,
                         max(32 << 20, 2 * footprint, footprint + (4 << 20))))

    cost = pl.CostEstimate(
        flops=2 * N_k * HW_k * C * P,
        transcendentals=0,
        bytes_accessed=(N_k * HW_k * C * in_bytes + C * P * 2
                        + N_k * HW_k * P * out_bytes + P * 4),
    )

    out = pl.pallas_call(
        _downsample_kernel,
        out_shape=jax.ShapeDtypeStruct((N_k, P, HW_k), out_dtype),
        grid_spec=pltpu.PrefetchScalarGridSpec(
            num_scalar_prefetch=0,
            grid=(N_k, n_tiles),
            in_specs=[
                pl.BlockSpec((1, C, tm), lambda n, j: (n, 0, j)),
                _const_spec((P, C)),
                _const_spec((P, 1)),
            ],
            out_specs=pl.BlockSpec((1, P, tm), lambda n, j: (n, 0, j)),
        ),
        compiler_params=pltpu.CompilerParams(
            dimension_semantics=("parallel", "parallel"),
            vmem_limit_bytes=vmem_limit,
        ),
        cost_estimate=cost,
    )(xs, w_mat, b_col)

    if pack_batch:
        out = out[0].reshape(P, N, HWo).transpose(1, 0, 2)          # back to (N, P, HWo)
    return out.reshape(N, P, Ho, Wo)                                # NCHW


# ------------------------------- references -----------------------------------

def _reference(x, weight, gamma, beta, running_mean, running_var,
               stride, bitW, eps=1e-5):
    """Pure-JAX f32 reference of the same math (eval-mode BN)."""
    P, C = weight.shape[0], weight.shape[1]
    w_q = _quantize_weight_dorefa(weight.astype(jnp.float32), bitW).reshape(P, C)
    xs = x[:, :, ::stride, ::stride]
    y = jnp.einsum("nchw,pc->nphw", xs, w_q)
    s = (gamma / jnp.sqrt(running_var + eps))[None, :, None, None]
    b = (beta - running_mean * gamma / jnp.sqrt(running_var + eps))[None, :, None, None]
    return y * s + b


def _reference_bf16(x, weight, gamma, beta, running_mean, running_var,
                    stride, bitW, eps=1e-5):
    """Reference that mimics the kernel arithmetic (bf16 inputs, f32 accumulate)."""
    P, C = weight.shape[0], weight.shape[1]
    w_q = _quantize_weight_dorefa(weight.astype(jnp.float32), bitW).reshape(P, C)
    s = gamma / jnp.sqrt(running_var + eps)
    b = beta - running_mean * s
    w_bf = (w_q * s[:, None]).astype(jnp.bfloat16)
    xs_bf = x[:, :, ::stride, ::stride].astype(jnp.bfloat16)
    y = jnp.einsum("nchw,pc->nphw", xs_bf, w_bf,
                   preferred_element_type=jnp.float32)
    return y + b[None, :, None, None]


if __name__ == "__main__":
    key = jax.random.PRNGKey(0)
    k1, k2, k3, k4, k5, k6 = jax.random.split(key, 6)

    # Small shapes consistent with a ResNet downsample: inplanes=4 -> planes=8,
    # kernel_size=1, stride=2.
    N, C, H, W = 2, 4, 16, 16
    P, stride, bitW = 8, 2, 8

    x = jax.random.normal(k1, (N, C, H, W), dtype=jnp.float32)
    weight = jax.random.normal(k2, (P, C, 1, 1), dtype=jnp.float32) * 0.1
    gamma = 1.0 + 0.1 * jax.random.normal(k3, (P,), dtype=jnp.float32)
    beta = 0.1 * jax.random.normal(k4, (P,), dtype=jnp.float32)
    running_mean = 0.1 * jax.random.normal(k5, (P,), dtype=jnp.float32)
    running_var = jnp.abs(1.0 + 0.1 * jax.random.normal(k6, (P,), dtype=jnp.float32))

    # --- stride = 2 (the module's typical downsample configuration) ----------
    out = downsample_layer_forward(
        x, weight, gamma, beta, running_mean, running_var,
        stride=stride, bitW=bitW)
    out = jax.block_until_ready(out)
    assert out.shape == (N, P, H // stride, W // stride), out.shape
    assert out.dtype == jnp.bfloat16, out.dtype

    out_f32 = out.astype(jnp.float32)
    ref = _reference(x, weight, gamma, beta, running_mean, running_var, stride, bitW)
    err_loose = float(jnp.max(jnp.abs(out_f32 - ref)))
    assert err_loose < 1.5e-1, err_loose

    ref_bf = _reference_bf16(x, weight, gamma, beta, running_mean, running_var,
                             stride, bitW)
    err_tight = float(jnp.max(jnp.abs(out_f32 - ref_bf)))
    assert err_tight < 5e-2, err_tight

    # --- stride = 1 path (fully fused: f32 straight into the kernel) ---------
    out1 = downsample_layer_forward(
        x, weight, gamma, beta, running_mean, running_var,
        stride=1, bitW=bitW)
    out1 = jax.block_until_ready(out1)
    assert out1.shape == (N, P, H, W), out1.shape

    out1_f32 = out1.astype(jnp.float32)
    ref1 = _reference(x, weight, gamma, beta, running_mean, running_var, 1, bitW)
    assert float(jnp.max(jnp.abs(out1_f32 - ref1))) < 1.5e-1
    ref1_bf = _reference_bf16(x, weight, gamma, beta, running_mean, running_var, 1, bitW)
    assert float(jnp.max(jnp.abs(out1_f32 - ref1_bf))) < 5e-2

    print("KERNEL_OK")
</pallas_src>

<mosaic_0001>
module attributes {stable_mosaic.version = 11 : i64} {
  func.func @_downsample_kernel(%arg0: i32, %arg1: i32, %arg2: memref<1x4x128xbf16, #tpu.memory_space<vmem>>, %arg3: memref<8x4xbf16, #tpu.memory_space<vmem>>, %arg4: memref<8x1xf32, #tpu.memory_space<vmem>>, %arg5: memref<1x8x128xbf16, #tpu.memory_space<vmem>>) attributes {dimension_semantics = [#tpu.dimension_semantics<parallel>, #tpu.dimension_semantics<parallel>], iteration_bounds = array<i64: 1, 1>, scalar_prefetch = 0 : i64, scratch_operands = 0 : i64, tpu.core_type = #tpu.core_type<tc>, window_params = [{transform_indices = @transform_0, window_bounds = array<i64: 1, 4, 128>}, {pipeline_mode = #tpu.pipeline_mode<synchronous>, transform_indices = @transform_1, window_bounds = array<i64: 8, 4>}, {pipeline_mode = #tpu.pipeline_mode<synchronous>, transform_indices = @transform_2, window_bounds = array<i64: 8, 1>}, {transform_indices = @transform_3, window_bounds = array<i64: 1, 8, 128>}]} {
    %c0 = arith.constant 0 : index
    %c0_0 = arith.constant 0 : index
    %c0_1 = arith.constant 0 : index
    %0 = vector.load %arg2[%c0, %c0_0, %c0_1] : memref<1x4x128xbf16, #tpu.memory_space<vmem>>, vector<1x4x128xbf16>
    %1 = vector.shape_cast %0 : vector<1x4x128xbf16> to vector<4x128xbf16>
    %c0_2 = arith.constant 0 : index
    %c0_3 = arith.constant 0 : index
    %2 = vector.load %arg3[%c0_2, %c0_3] : memref<8x4xbf16, #tpu.memory_space<vmem>>, vector<8x4xbf16>
    %cst = arith.constant dense<0.000000e+00> : vector<8x128xf32>
    %3 = tpu.matmul %2, %1, %cst {dimension_numbers = #tpu.dot_dimension_numbers<[1], [0], [0], [1], [0, 0, 1, 1], [], []>} : vector<8x4xbf16>, vector<4x128xbf16>, vector<8x128xf32> -> vector<8x128xf32>
    %c0_4 = arith.constant 0 : index
    %c0_5 = arith.constant 0 : index
    %4 = vector.load %arg4[%c0_4, %c0_5] : memref<8x1xf32, #tpu.memory_space<vmem>>, vector<8x1xf32>
    %5 = vector.broadcast %4 : vector<8x1xf32> to vector<8x128xf32>
    %6 = arith.addf %3, %5 : vector<8x128xf32>
    %7 = arith.truncf %6 : vector<8x128xf32> to vector<8x128xbf16>
    %c0_6 = arith.constant 0 : index
    %c0_7 = arith.constant 0 : index
    %c0_8 = arith.constant 0 : index
    %8 = vector.load %arg5[%c0_6, %c0_7, %c0_8] : memref<1x8x128xbf16, #tpu.memory_space<vmem>>, vector<1x8x128xbf16>
    %9 = vector.shape_cast %8 : vector<1x8x128xbf16> to vector<8x128xbf16>
    %10 = vector.shape_cast %7 : vector<8x128xbf16> to vector<1x8x128xbf16>
    tpu.vector_store %arg5[%c0_6, %c0_7, %c0_8], %10 {strides = array<i32>} : memref<1x8x128xbf16, #tpu.memory_space<vmem>>, vector<1x8x128xbf16>,
    return
  }
  func.func @transform_0(%arg0: i32, %arg1: i32) -> (i32, i32, i32) {
    %c0_i32 = arith.constant 0 : i32
    %c0_i32_0 = arith.constant 0 : i32
    return %arg0, %c0_i32, %arg1 : i32, i32, i32
  }
  func.func @transform_1(%arg0: i32, %arg1: i32) -> (i32, i32) {
    %c0_i32 = arith.constant 0 : i32
    %c0_i32_0 = arith.constant 0 : i32
    %c0_i32_1 = arith.constant 0 : i32
    return %c0_i32, %c0_i32_0 : i32, i32
  }
  func.func @transform_2(%arg0: i32, %arg1: i32) -> (i32, i32) {
    %c0_i32 = arith.constant 0 : i32
    %c0_i32_0 = arith.constant 0 : i32
    %c0_i32_1 = arith.constant 0 : i32
    return %c0_i32, %c0_i32_0 : i32, i32
  }
  func.func @transform_3(%arg0: i32, %arg1: i32) -> (i32, i32, i32) {
    %c0_i32 = arith.constant 0 : i32
    %c0_i32_0 = arith.constant 0 : i32
    return %arg0, %c0_i32, %arg1 : i32, i32, i32
  }
}

</mosaic_0001>

<bundles_post_ra>
// kernel: squeeze.1
= control target key start
LH: loop header
LB: loop body
LE: loop exit
PB: predicated region body
PF: predicated region fallthrough
CT: control target
= control target key end

     0   :  { %vm20_vm0 = vcmask 523264   ;;  %v112_v6 = vmov 0.0   ;;  %s150_s0 = inlined_call_operand.vmem [shape: bf16[1,8,128], index: 0, kind: input, shape index: {}]   ;;  %s151_s1 = inlined_call_operand.vmem [shape: bf16[8,2,64], index: 1, kind: output, shape index: {}]  }
   0x1   :  { %v15_v0 = vld [vmem:[%s150_s0] sm:$0xf]  ;;  %s111_s0 = smov 64  }
   0x2   :  { %v16_v1 = vunpack.c.l.bf16 %v15_v0 }
   0x4   :  { %21 = vst.msk [vmem:[#allocation0] ss:$8 sm:$0xf] %vm20_vm0, %v16_v1   ;;  %22 = vst.msk [vmem:[#allocation0] ss:$8 sm:$0xf0] %vm20_vm0, %v16_v1   ;;  %24 = vrot.lane.b32.xlu0 %v16_v1, %s111_s0 }
  0x76   :  { %v25_v2 = vpop.permute.xlu0 %24  }
  0x77   :  { %28 = vst.msk [vmem:[#allocation0 + $0x1] ss:$8 sm:$0xf] %vm20_vm0, %v25_v2   ;;  %30 = vst.msk [vmem:[#allocation0 + $0x1] ss:$8 sm:$0xf0] %vm20_vm0, %v25_v2  }
  0x7e   :  { %v36_v3 = vld [vmem:[#allocation0] sm:$0x3]  ;;  %v42_v4 = vld [vmem:[#allocation0 + $0x8] sm:$0x3]  ;;  %v49_v5 = vld [vmem:[#allocation0 + $0x10] sm:$0x3] }
  0x7f   :  { %v37_v7 = vpack.c.bf16 %v112_v6, %v36_v3  ;;  %v43_v8 = vpack.c.bf16 %v112_v6, %v42_v4  ;;  %v50_v9 = vpack.c.bf16 %v112_v6, %v49_v5  ;;  %v57_v10 = vld [vmem:[#allocation0 + $0x18] sm:$0x3]  ;;  %v65_v11 = vld [vmem:[#allocation0 + $0x20] sm:$0x3]  ;;  %v73_v12 = vld [vmem:[#allocation0 + $0x28] sm:$0x3] }
  0x80   :  { %v58_v13 = vpack.c.bf16 %v112_v6, %v57_v10  ;;  %v66_v14 = vpack.c.bf16 %v112_v6, %v65_v11  ;;  %v74_v15 = vpack.c.bf16 %v112_v6, %v73_v12  ;;  %v81_v16 = vld [vmem:[#allocation0 + $0x30] sm:$0x3]  ;;  %v89_v17 = vld [vmem:[#allocation0 + $0x38] sm:$0x3] }
  0x81   :  { %40 = vst [vmem:[%s151_s1] sm:$0x1] %v37_v7  ;;  %102 = vst [vmem:[%s151_s1 + $0x1] sm:$0x1] %v43_v8  ;;  %v82_v18 = vpack.c.bf16 %v112_v6, %v81_v16  ;;  %v90_v19 = vpack.c.bf16 %v112_v6, %v89_v17 }
  0x82   :  { %103 = vst [vmem:[%s151_s1 + $0x2] sm:$0x1] %v50_v9  ;;  %104 = vst [vmem:[%s151_s1 + $0x3] sm:$0x1] %v58_v13 }
  0x83   :  { %105 = vst [vmem:[%s151_s1 + $0x4] sm:$0x1] %v66_v14  ;;  %106 = vst [vmem:[%s151_s1 + $0x5] sm:$0x1] %v74_v15 }
  0x84   :  { %107 = vst [vmem:[%s151_s1 + $0x6] sm:$0x1] %v82_v18  ;;  %108 = vst [vmem:[%s151_s1 + $0x7] sm:$0x1] %v90_v19 }

// kernel: downsample_layer_forward.1
= control target key start
LH: loop header
LB: loop body
LE: loop exit
PB: predicated region body
PF: predicated region fallthrough
CT: control target
= control target key end

     0   :  { %vm27_vm0 = vcmask 1041408   ;;  %v90_v0 = vmov 0.0   ;;  %vm91_vm1 = vmmov 0   ;;  %v92_v4 = vmov 0   ;;  %s125_s0 = inlined_call_operand.vmem [shape: bf16[1,4,128], index: 0, kind: input, shape index: {}]   ;;  %s126_s1 = inlined_call_operand.vmem [shape: bf16[8,4], index: 1, kind: input, shape index: {}]   ;;  %s127_s2 = inlined_call_operand.vmem [shape: f32[8,1], index: 2, kind: input, shape index: {}]   ;;  %s128_s3 = inlined_call_operand.vmem [shape: bf16[1,8,128], index: 3, kind: output, shape index: {}]  }
   0x1   :  { %80 = vmatprep.subr.bf16.mxu0 %v90_v0  ;;  %v15_v1 = vld [vmem:[%s125_s0] sm:$0x3]  ;;  %82 = vmatprep.mubr.msk.bf16.mxu0 %vm91_vm1, %v90_v0  ;;  %vm23_vm2 = vcmask 31744  }
   0x2   :  { %v17_v2 = vld [vmem:[%s127_s2] sm:$0xff]  ;;  %v29_v3 = vsel %vm27_vm0, %v15_v1, 0  ;;  %89 = vset.pattern.permute.xlu0 %v92_v4 }
   0x3   :  { %81 = vmatpush3.bf16.msra.mxu0 %v29_v3  ;;  %v16_v5 = vld [vmem:[%s126_s1] sm:$0xf]  ;;  %20 = vperm.xlu0 %89, %v17_v2  }
   0x6   :  { %83 = vmatmul.mubr.msk.bf16.vlgmr.msra.gmra.mxu0 %vm23_vm2, %v16_v5 }
  0x7e   :  { %v21_v6 = vpop.permute.xlu0 %20 }
  0xc6   :  { %v65_v7 = vpop.f32.mrf.mxu0 }
  0xc7   :  { %v66_v8 = vadd.f32 %v65_v7, %v21_v6 }
  0xc8   :  { %v84_v9 = vpop.f32.mrf.mxu0 }
  0xc9   :  { %v71_v10 = vpack.c.bf16 %v66_v8, %v66_v8 }
  0xca   :  { %v68_v11 = vpop.f32.mrf.mxu0 }
  0xcb   :  { %72 = vst [vmem:[%s128_s3] sm:$0xf] %v71_v10 }
  0xcc   :  { %v85_v12 = vpop.f32.mrf.mxu0 }

</bundles_post_ra>
